<compile_context>
chip_gen: v7x
topology: tpu7x:2x2x1
jax: 0.10.0
libtpu: 0.0.40
codegen_flags: <defaults>
</compile_context>

<pallas_src>
import jax
import jax.numpy as jnp
from jax.experimental import pallas as pl
from jax.experimental.pallas import tpu as pltpu

N_EMBED = 32
N_HEAD = 4
HEAD_SIZE = N_EMBED // N_HEAD
BLOCK_SIZE = 8            # sequence length T
EPS = 1e-5                # nn.LayerNorm default eps

# ---- packed-parameter slab layout (single (N_ROWS, 128) f32 array) ----
LANES = 4 * N_EMBED                    # 128
ROW_WQKV = 8                           # rows 8..39,   cols 0:96  : fused QKV (Q pre-scaled)
ROW_WPROJ = ROW_WQKV + N_EMBED         # rows 40..71,  cols 0:32  : output projection
ROW_W1 = ROW_WPROJ + N_EMBED           # rows 72..103, cols 0:128 : FF expand
ROW_W2 = ROW_W1 + N_EMBED              # rows 104..231,cols 0:32  : FF contract
N_ROWS = ROW_W2 + 4 * N_EMBED          # 232
# row 0: ln1_w | ln1_b | ln2_w | ln2_b   (4 x 32 lanes)
# row 1: b1 (128 lanes)
# row 2: bproj | b2


def _layer_norm(z, w, b):
    mu = jnp.mean(z, axis=-1, keepdims=True)
    var = jnp.mean((z - mu) ** 2, axis=-1, keepdims=True)
    return (z - mu) * jax.lax.rsqrt(var + EPS) * w + b


def block_kernel(x_ref, p_ref, out_ref):
    bb, T, C = x_ref.shape
    # T == 8 matches the sublane tile, so this reshape is a layout no-op.
    x = x_ref[...].reshape(bb * T, C)

    # ---- static views into the packed parameter slab (no data movement) ----
    ln1_w = p_ref[0:1, 0:C]
    ln1_b = p_ref[0:1, C:2 * C]
    ln2_w = p_ref[0:1, 2 * C:3 * C]
    ln2_b = p_ref[0:1, 3 * C:4 * C]
    b1 = p_ref[1:2, 0:4 * C]
    bproj = p_ref[2:3, 0:C]
    b2 = p_ref[2:3, C:2 * C]
    wqkv = p_ref[ROW_WQKV:ROW_WQKV + C, 0:3 * C]        # Q cols carry C**-0.5
    wproj = p_ref[ROW_WPROJ:ROW_WPROJ + C, 0:C]
    w1 = p_ref[ROW_W1:ROW_W1 + C, 0:4 * C]
    w2 = p_ref[ROW_W2:ROW_W2 + 4 * C, 0:C]

    # ---- x = x + sa(ln1(x)) ----
    h1 = _layer_norm(x, ln1_w, ln1_b)                                  # (rows, C)
    qkv = jnp.dot(h1, wqkv, preferred_element_type=jnp.float32)        # (rows, 3C)

    r_iota = jax.lax.broadcasted_iota(jnp.int32, (T, T), 0)
    c_iota = jax.lax.broadcasted_iota(jnp.int32, (T, T), 1)
    causal = r_iota >= c_iota

    att_rows = []
    for b in range(bb):                       # static unroll (bb is small)
        r0 = b * T
        head_outs = []
        for h in range(N_HEAD):               # static unroll over heads
            q = qkv[r0:r0 + T, h * HEAD_SIZE:(h + 1) * HEAD_SIZE]
            k = qkv[r0:r0 + T, C + h * HEAD_SIZE:C + (h + 1) * HEAD_SIZE]
            v = qkv[r0:r0 + T, 2 * C + h * HEAD_SIZE:2 * C + (h + 1) * HEAD_SIZE]
            wei = jnp.dot(q, k.T, preferred_element_type=jnp.float32)  # (T, T)
            wei = jnp.where(causal, wei, -jnp.inf)
            wei = wei - jnp.max(wei, axis=-1, keepdims=True)
            prob = jnp.exp(wei)
            prob = prob * pl.reciprocal(
                jnp.sum(prob, axis=-1, keepdims=True), approx=True)
            head_outs.append(jnp.dot(prob, v, preferred_element_type=jnp.float32))
        att_rows.append(jnp.concatenate(head_outs, axis=-1))           # (T, C)
    att = att_rows[0] if bb == 1 else jnp.concatenate(att_rows, axis=0)

    sa = jnp.dot(att, wproj, preferred_element_type=jnp.float32) + bproj
    x1 = x + sa

    # ---- x = x + ffwd(ln2(x)) ----
    h2 = _layer_norm(x1, ln2_w, ln2_b)
    ff = jnp.maximum(jnp.dot(h2, w1, preferred_element_type=jnp.float32) + b1, 0.0)
    ff = jnp.dot(ff, w2, preferred_element_type=jnp.float32) + b2

    out_ref[...] = (x1 + ff).reshape(bb, T, C).astype(out_ref.dtype)


def init_params(key):
    """Deterministic synthetic parameters (PyTorch-Linear-style uniform init)."""
    ks = jax.random.split(key, 9)

    def lin(k, fan_in, shape):
        bound = 1.0 / (fan_in ** 0.5)
        return jax.random.uniform(k, shape, jnp.float32, -bound, bound)

    return dict(
        ln1_w=jnp.ones((N_EMBED,), jnp.float32),
        ln1_b=jnp.zeros((N_EMBED,), jnp.float32),
        # per-head q/k/v weights, pre-transposed so  h1 @ w[h] -> (T, head_size)
        wq=lin(ks[0], N_EMBED, (N_HEAD, N_EMBED, HEAD_SIZE)),
        wk=lin(ks[1], N_EMBED, (N_HEAD, N_EMBED, HEAD_SIZE)),
        wv=lin(ks[2], N_EMBED, (N_HEAD, N_EMBED, HEAD_SIZE)),
        # output projection split per head: (NH, HS, C)
        wproj=lin(ks[3], N_EMBED, (N_HEAD, HEAD_SIZE, N_EMBED)),
        bproj=lin(ks[4], N_EMBED, (N_EMBED,)),
        ln2_w=jnp.ones((N_EMBED,), jnp.float32),
        ln2_b=jnp.zeros((N_EMBED,), jnp.float32),
        w1=lin(ks[5], N_EMBED, (N_EMBED, 4 * N_EMBED)),
        b1=lin(ks[6], N_EMBED, (4 * N_EMBED,)),
        w2=lin(ks[7], 4 * N_EMBED, (4 * N_EMBED, N_EMBED)),
        b2=lin(ks[8], 4 * N_EMBED, (N_EMBED,)),
    )


def pack_params(p):
    """Pack all parameters into one lane-aligned (N_ROWS, 128) f32 slab."""
    C = N_EMBED
    # head h occupies cols h*HS:(h+1)*HS of each block, matching kernel slicing
    wq = jnp.transpose(p['wq'], (1, 0, 2)).reshape(C, C)
    wk = jnp.transpose(p['wk'], (1, 0, 2)).reshape(C, C)
    wv = jnp.transpose(p['wv'], (1, 0, 2)).reshape(C, C)
    wqkv = jnp.concatenate([wq * (C ** -0.5), wk, wv], axis=1)   # scale folded into Q
    wproj = p['wproj'].reshape(C, C)                              # rows h*HS.. = head h

    slab = jnp.zeros((N_ROWS, LANES), jnp.float32)
    slab = slab.at[0, 0:C].set(p['ln1_w'])
    slab = slab.at[0, C:2 * C].set(p['ln1_b'])
    slab = slab.at[0, 2 * C:3 * C].set(p['ln2_w'])
    slab = slab.at[0, 3 * C:4 * C].set(p['ln2_b'])
    slab = slab.at[1, 0:4 * C].set(p['b1'])
    slab = slab.at[2, 0:C].set(p['bproj'])
    slab = slab.at[2, C:2 * C].set(p['b2'])
    slab = slab.at[ROW_WQKV:ROW_WQKV + C, 0:3 * C].set(wqkv)
    slab = slab.at[ROW_WPROJ:ROW_WPROJ + C, 0:C].set(wproj)
    slab = slab.at[ROW_W1:ROW_W1 + C, 0:4 * C].set(p['w1'])
    slab = slab.at[ROW_W2:ROW_W2 + 4 * C, 0:C].set(p['w2'])
    return slab


def block_forward(x, packed_params, *, batch_block=None):
    B, T, C = x.shape
    if batch_block is None:
        # >=2 parallel grid steps when B > 1 (keeps both v7x TensorCores busy)
        # while amortizing per-step overhead for large B; cap the block so
        # activation buffers stay tiny relative to VMEM on every generation.
        batch_block = min(max(1, pl.cdiv(B, 2)), 1024)
    grid = (pl.cdiv(B, batch_block),)

    grid_spec = pltpu.PrefetchScalarGridSpec(
        num_scalar_prefetch=0,
        grid=grid,
        in_specs=[
            pl.BlockSpec((batch_block, T, C), lambda i: (i, 0, 0)),   # x tile
            pl.BlockSpec((N_ROWS, LANES), lambda i: (0, 0)),          # params (DMA'd once)
        ],
        out_specs=pl.BlockSpec((batch_block, T, C), lambda i: (i, 0, 0)),
    )
    return pl.pallas_call(
        block_kernel,
        out_shape=jax.ShapeDtypeStruct((B, T, C), x.dtype),
        grid_spec=grid_spec,
        compiler_params=pltpu.CompilerParams(dimension_semantics=("parallel",)),
    )(x, packed_params)


def block_reference(x, p):
    """Pure-JAX reference for correctness checking (uses unpacked params)."""
    def ln(z, w, b):
        mu = jnp.mean(z, -1, keepdims=True)
        var = jnp.mean((z - mu) ** 2, -1, keepdims=True)
        return (z - mu) / jnp.sqrt(var + EPS) * w + b

    B, T, C = x.shape
    h1 = ln(x, p['ln1_w'], p['ln1_b'])
    causal = jnp.tril(jnp.ones((T, T), bool))
    heads = []
    for h in range(N_HEAD):
        q = h1 @ p['wq'][h]
        k = h1 @ p['wk'][h]
        v = h1 @ p['wv'][h]
        wei = jnp.einsum('btd,bsd->bts', q, k) * C ** -0.5
        wei = jnp.where(causal, wei, -jnp.inf)
        wei = jax.nn.softmax(wei, axis=-1)
        heads.append(jnp.einsum('bts,bsd->btd', wei, v))
    sa = jnp.concatenate(heads, axis=-1) @ p['wproj'].reshape(C, C) + p['bproj']
    x1 = x + sa
    h2 = ln(x1, p['ln2_w'], p['ln2_b'])
    ff = jax.nn.relu(h2 @ p['w1'] + p['b1']) @ p['w2'] + p['b2']
    return x1 + ff


if __name__ == "__main__":
    key = jax.random.PRNGKey(0)
    kx, kp = jax.random.split(key)
    x = jax.random.normal(kx, (2, BLOCK_SIZE, N_EMBED), jnp.float32)  # (B, T, C)
    params = init_params(kp)
    slab = pack_params(params)

    out = jax.block_until_ready(block_forward(x, slab))

    ref = block_reference(x, params)
    assert out.shape == x.shape and out.dtype == x.dtype
    # tolerance accommodates the approximate (EUP) reciprocal in the softmax
    assert jnp.allclose(out, ref, atol=2e-3, rtol=2e-3), "kernel/reference mismatch"
    print("KERNEL_OK")
</pallas_src>

<mosaic_0001>
module attributes {stable_mosaic.version = 11 : i64} {
  func.func @block_kernel(%arg0: i32, %arg1: memref<1x8x32xf32, #tpu.memory_space<vmem>>, %arg2: memref<232x128xf32, #tpu.memory_space<vmem>>, %arg3: memref<1x8x32xf32, #tpu.memory_space<vmem>>) attributes {dimension_semantics = [#tpu.dimension_semantics<parallel>], iteration_bounds = array<i64: 2>, scalar_prefetch = 0 : i64, scratch_operands = 0 : i64, tpu.core_type = #tpu.core_type<tc>, window_params = [{transform_indices = @transform_0, window_bounds = array<i64: 1, 8, 32>}, {pipeline_mode = #tpu.pipeline_mode<synchronous>, transform_indices = @transform_1, window_bounds = array<i64: 232, 128>}, {transform_indices = @transform_2, window_bounds = array<i64: 1, 8, 32>}]} {
    %c0 = arith.constant 0 : index
    %c0_0 = arith.constant 0 : index
    %c0_1 = arith.constant 0 : index
    %0 = vector.load %arg1[%c0, %c0_0, %c0_1] : memref<1x8x32xf32, #tpu.memory_space<vmem>>, vector<1x8x32xf32>
    %1 = vector.shape_cast %0 : vector<1x8x32xf32> to vector<8x32xf32>
    %c0_2 = arith.constant 0 : index
    %c0_3 = arith.constant 0 : index
    %2 = vector.load %arg2[%c0_2, %c0_3] : memref<232x128xf32, #tpu.memory_space<vmem>>, vector<1x32xf32>
    %c0_4 = arith.constant 0 : index
    %c32 = arith.constant 32 : index
    %3 = vector.load %arg2[%c0_4, %c32] : memref<232x128xf32, #tpu.memory_space<vmem>>, vector<1x32xf32>
    %c0_5 = arith.constant 0 : index
    %c64 = arith.constant 64 : index
    %4 = vector.load %arg2[%c0_5, %c64] : memref<232x128xf32, #tpu.memory_space<vmem>>, vector<1x32xf32>
    %c0_6 = arith.constant 0 : index
    %c96 = arith.constant 96 : index
    %5 = vector.load %arg2[%c0_6, %c96] : memref<232x128xf32, #tpu.memory_space<vmem>>, vector<1x32xf32>
    %c1 = arith.constant 1 : index
    %c0_7 = arith.constant 0 : index
    %6 = vector.load %arg2[%c1, %c0_7] : memref<232x128xf32, #tpu.memory_space<vmem>>, vector<1x128xf32>
    %c2 = arith.constant 2 : index
    %c0_8 = arith.constant 0 : index
    %7 = vector.load %arg2[%c2, %c0_8] : memref<232x128xf32, #tpu.memory_space<vmem>>, vector<1x32xf32>
    %c2_9 = arith.constant 2 : index
    %c32_10 = arith.constant 32 : index
    %8 = vector.load %arg2[%c2_9, %c32_10] : memref<232x128xf32, #tpu.memory_space<vmem>>, vector<1x32xf32>
    %c8 = arith.constant 8 : index
    %c0_11 = arith.constant 0 : index
    %9 = vector.load %arg2[%c8, %c0_11] : memref<232x128xf32, #tpu.memory_space<vmem>>, vector<32x96xf32>
    %c40 = arith.constant 40 : index
    %c0_12 = arith.constant 0 : index
    %10 = vector.load %arg2[%c40, %c0_12] : memref<232x128xf32, #tpu.memory_space<vmem>>, vector<32x32xf32>
    %c72 = arith.constant 72 : index
    %c0_13 = arith.constant 0 : index
    %11 = vector.load %arg2[%c72, %c0_13] : memref<232x128xf32, #tpu.memory_space<vmem>>, vector<32x128xf32>
    %c104 = arith.constant 104 : index
    %c0_14 = arith.constant 0 : index
    %12 = vector.load %arg2[%c104, %c0_14] : memref<232x128xf32, #tpu.memory_space<vmem>>, vector<128x32xf32>
    %cst = arith.constant dense<0.000000e+00> : vector<8xf32>
    %13 = vector.multi_reduction <add>, %1, %cst [1] : vector<8x32xf32> to vector<8xf32>
    %14 = vector.shape_cast %13 : vector<8xf32> to vector<8x1xf32>
    %cst_15 = arith.constant 3.200000e+01 : f32
    %15 = vector.broadcast %cst_15 : f32 to vector<8x1xf32>
    %16 = arith.divf %14, %15 : vector<8x1xf32>
    %17 = vector.broadcast %16 : vector<8x1xf32> to vector<8x32xf32>
    %18 = arith.subf %1, %17 : vector<8x32xf32>
    %19 = arith.mulf %18, %18 : vector<8x32xf32>
    %cst_16 = arith.constant dense<0.000000e+00> : vector<8xf32>
    %20 = vector.multi_reduction <add>, %19, %cst_16 [1] : vector<8x32xf32> to vector<8xf32>
    %21 = vector.shape_cast %20 : vector<8xf32> to vector<8x1xf32>
    %cst_17 = arith.constant 3.200000e+01 : f32
    %22 = vector.broadcast %cst_17 : f32 to vector<8x1xf32>
    %23 = arith.divf %21, %22 : vector<8x1xf32>
    %24 = vector.broadcast %16 : vector<8x1xf32> to vector<8x32xf32>
    %25 = arith.subf %1, %24 : vector<8x32xf32>
    %cst_18 = arith.constant 9.99999974E-6 : f32
    %26 = vector.broadcast %cst_18 : f32 to vector<8x1xf32>
    %27 = arith.addf %23, %26 : vector<8x1xf32>
    %28 = math.rsqrt %27 : vector<8x1xf32>
    %29 = vector.broadcast %28 : vector<8x1xf32> to vector<8x32xf32>
    %30 = arith.mulf %25, %29 : vector<8x32xf32>
    %31 = vector.broadcast %2 : vector<1x32xf32> to vector<8x32xf32>
    %32 = arith.mulf %30, %31 : vector<8x32xf32>
    %33 = vector.broadcast %3 : vector<1x32xf32> to vector<8x32xf32>
    %34 = arith.addf %32, %33 : vector<8x32xf32>
    %cst_19 = arith.constant dense<0.000000e+00> : vector<8x96xf32>
    %35 = tpu.matmul %34, %9, %cst_19 {dimension_numbers = #tpu.dot_dimension_numbers<[1], [0], [0], [1], [0, 0, 1, 1], [], []>} : vector<8x32xf32>, vector<32x96xf32>, vector<8x96xf32> -> vector<8x96xf32>
    %36 = tpu.iota {dimensions = array<i32: 0>} : vector<8x8xi32>
    %37 = tpu.iota {dimensions = array<i32: 1>} : vector<8x8xi32>
    %38 = arith.cmpi sge, %36, %37 : vector<8x8xi32>
    %39 = vector.extract_strided_slice %35 {offsets = [0, 0], sizes = [8, 8], strides = [1, 1]} : vector<8x96xf32> to vector<8x8xf32>
    %40 = vector.extract_strided_slice %35 {offsets = [0, 32], sizes = [8, 8], strides = [1, 1]} : vector<8x96xf32> to vector<8x8xf32>
    %41 = vector.extract_strided_slice %35 {offsets = [0, 64], sizes = [8, 8], strides = [1, 1]} : vector<8x96xf32> to vector<8x8xf32>
    %42 = tpu.transpose %40, [1, 0] : vector<8x8xf32> -> vector<8x8xf32>
    %cst_20 = arith.constant dense<0.000000e+00> : vector<8x8xf32>
    %43 = tpu.matmul %39, %42, %cst_20 {dimension_numbers = #tpu.dot_dimension_numbers<[1], [0], [0], [1], [0, 0, 1, 1], [], []>} : vector<8x8xf32>, vector<8x8xf32>, vector<8x8xf32> -> vector<8x8xf32>
    %cst_21 = arith.constant 0xFF800000 : f32
    %44 = vector.broadcast %cst_21 : f32 to vector<8x8xf32>
    %45 = arith.select %38, %43, %44 : vector<8x8xi1>, vector<8x8xf32>
    %cst_22 = arith.constant dense<0xFF800000> : vector<8xf32>
    %46 = vector.multi_reduction <maximumf>, %45, %cst_22 [1] : vector<8x8xf32> to vector<8xf32>
    %47 = vector.shape_cast %46 : vector<8xf32> to vector<8x1xf32>
    %48 = vector.broadcast %47 : vector<8x1xf32> to vector<8x8xf32>
    %49 = arith.subf %45, %48 : vector<8x8xf32>
    %50 = math.exp %49 : vector<8x8xf32>
    %cst_23 = arith.constant dense<0.000000e+00> : vector<8xf32>
    %51 = vector.multi_reduction <add>, %50, %cst_23 [1] : vector<8x8xf32> to vector<8xf32>
    %52 = vector.shape_cast %51 : vector<8xf32> to vector<8x1xf32>
    %53 = tpu.reciprocal %52 {approx = true} : vector<8x1xf32> -> vector<8x1xf32>
    %54 = vector.broadcast %53 : vector<8x1xf32> to vector<8x8xf32>
    %55 = arith.mulf %50, %54 : vector<8x8xf32>
    %cst_24 = arith.constant dense<0.000000e+00> : vector<8x8xf32>
    %56 = tpu.matmul %55, %41, %cst_24 {dimension_numbers = #tpu.dot_dimension_numbers<[1], [0], [0], [1], [0, 0, 1, 1], [], []>} : vector<8x8xf32>, vector<8x8xf32>, vector<8x8xf32> -> vector<8x8xf32>
    %57 = vector.extract_strided_slice %35 {offsets = [0, 8], sizes = [8, 8], strides = [1, 1]} : vector<8x96xf32> to vector<8x8xf32>
    %58 = vector.extract_strided_slice %35 {offsets = [0, 40], sizes = [8, 8], strides = [1, 1]} : vector<8x96xf32> to vector<8x8xf32>
    %59 = vector.extract_strided_slice %35 {offsets = [0, 72], sizes = [8, 8], strides = [1, 1]} : vector<8x96xf32> to vector<8x8xf32>
    %60 = tpu.transpose %58, [1, 0] : vector<8x8xf32> -> vector<8x8xf32>
    %cst_25 = arith.constant dense<0.000000e+00> : vector<8x8xf32>
    %61 = tpu.matmul %57, %60, %cst_25 {dimension_numbers = #tpu.dot_dimension_numbers<[1], [0], [0], [1], [0, 0, 1, 1], [], []>} : vector<8x8xf32>, vector<8x8xf32>, vector<8x8xf32> -> vector<8x8xf32>
    %cst_26 = arith.constant 0xFF800000 : f32
    %62 = vector.broadcast %cst_26 : f32 to vector<8x8xf32>
    %63 = arith.select %38, %61, %62 : vector<8x8xi1>, vector<8x8xf32>
    %cst_27 = arith.constant dense<0xFF800000> : vector<8xf32>
    %64 = vector.multi_reduction <maximumf>, %63, %cst_27 [1] : vector<8x8xf32> to vector<8xf32>
    %65 = vector.shape_cast %64 : vector<8xf32> to vector<8x1xf32>
    %66 = vector.broadcast %65 : vector<8x1xf32> to vector<8x8xf32>
    %67 = arith.subf %63, %66 : vector<8x8xf32>
    %68 = math.exp %67 : vector<8x8xf32>
    %cst_28 = arith.constant dense<0.000000e+00> : vector<8xf32>
    %69 = vector.multi_reduction <add>, %68, %cst_28 [1] : vector<8x8xf32> to vector<8xf32>
    %70 = vector.shape_cast %69 : vector<8xf32> to vector<8x1xf32>
    %71 = tpu.reciprocal %70 {approx = true} : vector<8x1xf32> -> vector<8x1xf32>
    %72 = vector.broadcast %71 : vector<8x1xf32> to vector<8x8xf32>
    %73 = arith.mulf %68, %72 : vector<8x8xf32>
    %cst_29 = arith.constant dense<0.000000e+00> : vector<8x8xf32>
    %74 = tpu.matmul %73, %59, %cst_29 {dimension_numbers = #tpu.dot_dimension_numbers<[1], [0], [0], [1], [0, 0, 1, 1], [], []>} : vector<8x8xf32>, vector<8x8xf32>, vector<8x8xf32> -> vector<8x8xf32>
    %75 = vector.extract_strided_slice %35 {offsets = [0, 16], sizes = [8, 8], strides = [1, 1]} : vector<8x96xf32> to vector<8x8xf32>
    %76 = vector.extract_strided_slice %35 {offsets = [0, 48], sizes = [8, 8], strides = [1, 1]} : vector<8x96xf32> to vector<8x8xf32>
    %77 = vector.extract_strided_slice %35 {offsets = [0, 80], sizes = [8, 8], strides = [1, 1]} : vector<8x96xf32> to vector<8x8xf32>
    %78 = tpu.transpose %76, [1, 0] : vector<8x8xf32> -> vector<8x8xf32>
    %cst_30 = arith.constant dense<0.000000e+00> : vector<8x8xf32>
    %79 = tpu.matmul %75, %78, %cst_30 {dimension_numbers = #tpu.dot_dimension_numbers<[1], [0], [0], [1], [0, 0, 1, 1], [], []>} : vector<8x8xf32>, vector<8x8xf32>, vector<8x8xf32> -> vector<8x8xf32>
    %cst_31 = arith.constant 0xFF800000 : f32
    %80 = vector.broadcast %cst_31 : f32 to vector<8x8xf32>
    %81 = arith.select %38, %79, %80 : vector<8x8xi1>, vector<8x8xf32>
    %cst_32 = arith.constant dense<0xFF800000> : vector<8xf32>
    %82 = vector.multi_reduction <maximumf>, %81, %cst_32 [1] : vector<8x8xf32> to vector<8xf32>
    %83 = vector.shape_cast %82 : vector<8xf32> to vector<8x1xf32>
    %84 = vector.broadcast %83 : vector<8x1xf32> to vector<8x8xf32>
    %85 = arith.subf %81, %84 : vector<8x8xf32>
    %86 = math.exp %85 : vector<8x8xf32>
    %cst_33 = arith.constant dense<0.000000e+00> : vector<8xf32>
    %87 = vector.multi_reduction <add>, %86, %cst_33 [1] : vector<8x8xf32> to vector<8xf32>
    %88 = vector.shape_cast %87 : vector<8xf32> to vector<8x1xf32>
    %89 = tpu.reciprocal %88 {approx = true} : vector<8x1xf32> -> vector<8x1xf32>
    %90 = vector.broadcast %89 : vector<8x1xf32> to vector<8x8xf32>
    %91 = arith.mulf %86, %90 : vector<8x8xf32>
    %cst_34 = arith.constant dense<0.000000e+00> : vector<8x8xf32>
    %92 = tpu.matmul %91, %77, %cst_34 {dimension_numbers = #tpu.dot_dimension_numbers<[1], [0], [0], [1], [0, 0, 1, 1], [], []>} : vector<8x8xf32>, vector<8x8xf32>, vector<8x8xf32> -> vector<8x8xf32>
    %93 = vector.extract_strided_slice %35 {offsets = [0, 24], sizes = [8, 8], strides = [1, 1]} : vector<8x96xf32> to vector<8x8xf32>
    %94 = vector.extract_strided_slice %35 {offsets = [0, 56], sizes = [8, 8], strides = [1, 1]} : vector<8x96xf32> to vector<8x8xf32>
    %95 = vector.extract_strided_slice %35 {offsets = [0, 88], sizes = [8, 8], strides = [1, 1]} : vector<8x96xf32> to vector<8x8xf32>
    %96 = tpu.transpose %94, [1, 0] : vector<8x8xf32> -> vector<8x8xf32>
    %cst_35 = arith.constant dense<0.000000e+00> : vector<8x8xf32>
    %97 = tpu.matmul %93, %96, %cst_35 {dimension_numbers = #tpu.dot_dimension_numbers<[1], [0], [0], [1], [0, 0, 1, 1], [], []>} : vector<8x8xf32>, vector<8x8xf32>, vector<8x8xf32> -> vector<8x8xf32>
    %cst_36 = arith.constant 0xFF800000 : f32
    %98 = vector.broadcast %cst_36 : f32 to vector<8x8xf32>
    %99 = arith.select %38, %97, %98 : vector<8x8xi1>, vector<8x8xf32>
    %cst_37 = arith.constant dense<0xFF800000> : vector<8xf32>
    %100 = vector.multi_reduction <maximumf>, %99, %cst_37 [1] : vector<8x8xf32> to vector<8xf32>
    %101 = vector.shape_cast %100 : vector<8xf32> to vector<8x1xf32>
    %102 = vector.broadcast %101 : vector<8x1xf32> to vector<8x8xf32>
    %103 = arith.subf %99, %102 : vector<8x8xf32>
    %104 = math.exp %103 : vector<8x8xf32>
    %cst_38 = arith.constant dense<0.000000e+00> : vector<8xf32>
    %105 = vector.multi_reduction <add>, %104, %cst_38 [1] : vector<8x8xf32> to vector<8xf32>
    %106 = vector.shape_cast %105 : vector<8xf32> to vector<8x1xf32>
    %107 = tpu.reciprocal %106 {approx = true} : vector<8x1xf32> -> vector<8x1xf32>
    %108 = vector.broadcast %107 : vector<8x1xf32> to vector<8x8xf32>
    %109 = arith.mulf %104, %108 : vector<8x8xf32>
    %cst_39 = arith.constant dense<0.000000e+00> : vector<8x8xf32>
    %110 = tpu.matmul %109, %95, %cst_39 {dimension_numbers = #tpu.dot_dimension_numbers<[1], [0], [0], [1], [0, 0, 1, 1], [], []>} : vector<8x8xf32>, vector<8x8xf32>, vector<8x8xf32> -> vector<8x8xf32>
    %111 = tpu.concatenate %56, %74, %92, %110 in 1 : vector<8x8xf32>, vector<8x8xf32>, vector<8x8xf32>, vector<8x8xf32> -> vector<8x32xf32>
    %cst_40 = arith.constant dense<0.000000e+00> : vector<8x32xf32>
    %112 = tpu.matmul %111, %10, %cst_40 {dimension_numbers = #tpu.dot_dimension_numbers<[1], [0], [0], [1], [0, 0, 1, 1], [], []>} : vector<8x32xf32>, vector<32x32xf32>, vector<8x32xf32> -> vector<8x32xf32>
    %113 = vector.broadcast %7 : vector<1x32xf32> to vector<8x32xf32>
    %114 = arith.addf %112, %113 : vector<8x32xf32>
    %115 = arith.addf %1, %114 : vector<8x32xf32>
    %cst_41 = arith.constant dense<0.000000e+00> : vector<8xf32>
    %116 = vector.multi_reduction <add>, %115, %cst_41 [1] : vector<8x32xf32> to vector<8xf32>
    %117 = vector.shape_cast %116 : vector<8xf32> to vector<8x1xf32>
    %cst_42 = arith.constant 3.200000e+01 : f32
    %118 = vector.broadcast %cst_42 : f32 to vector<8x1xf32>
    %119 = arith.divf %117, %118 : vector<8x1xf32>
    %120 = vector.broadcast %119 : vector<8x1xf32> to vector<8x32xf32>
    %121 = arith.subf %115, %120 : vector<8x32xf32>
    %122 = arith.mulf %121, %121 : vector<8x32xf32>
    %cst_43 = arith.constant dense<0.000000e+00> : vector<8xf32>
    %123 = vector.multi_reduction <add>, %122, %cst_43 [1] : vector<8x32xf32> to vector<8xf32>
    %124 = vector.shape_cast %123 : vector<8xf32> to vector<8x1xf32>
    %cst_44 = arith.constant 3.200000e+01 : f32
    %125 = vector.broadcast %cst_44 : f32 to vector<8x1xf32>
    %126 = arith.divf %124, %125 : vector<8x1xf32>
    %127 = vector.broadcast %119 : vector<8x1xf32> to vector<8x32xf32>
    %128 = arith.subf %115, %127 : vector<8x32xf32>
    %cst_45 = arith.constant 9.99999974E-6 : f32
    %129 = vector.broadcast %cst_45 : f32 to vector<8x1xf32>
    %130 = arith.addf %126, %129 : vector<8x1xf32>
    %131 = math.rsqrt %130 : vector<8x1xf32>
    %132 = vector.broadcast %131 : vector<8x1xf32> to vector<8x32xf32>
    %133 = arith.mulf %128, %132 : vector<8x32xf32>
    %134 = vector.broadcast %4 : vector<1x32xf32> to vector<8x32xf32>
    %135 = arith.mulf %133, %134 : vector<8x32xf32>
    %136 = vector.broadcast %5 : vector<1x32xf32> to vector<8x32xf32>
    %137 = arith.addf %135, %136 : vector<8x32xf32>
    %cst_46 = arith.constant dense<0.000000e+00> : vector<8x128xf32>
    %138 = tpu.matmul %137, %11, %cst_46 {dimension_numbers = #tpu.dot_dimension_numbers<[1], [0], [0], [1], [0, 0, 1, 1], [], []>} : vector<8x32xf32>, vector<32x128xf32>, vector<8x128xf32> -> vector<8x128xf32>
    %139 = vector.broadcast %6 : vector<1x128xf32> to vector<8x128xf32>
    %140 = arith.addf %138, %139 : vector<8x128xf32>
    %cst_47 = arith.constant 0.000000e+00 : f32
    %141 = vector.broadcast %cst_47 : f32 to vector<8x128xf32>
    %142 = arith.maximumf %140, %141 : vector<8x128xf32>
    %cst_48 = arith.constant dense<0.000000e+00> : vector<8x32xf32>
    %143 = tpu.matmul %142, %12, %cst_48 {dimension_numbers = #tpu.dot_dimension_numbers<[1], [0], [0], [1], [0, 0, 1, 1], [], []>} : vector<8x128xf32>, vector<128x32xf32>, vector<8x32xf32> -> vector<8x32xf32>
    %144 = vector.broadcast %8 : vector<1x32xf32> to vector<8x32xf32>
    %145 = arith.addf %143, %144 : vector<8x32xf32>
    %146 = arith.addf %115, %145 : vector<8x32xf32>
    %147 = vector.shape_cast %146 : vector<8x32xf32> to vector<1x8x32xf32>
    %c0_49 = arith.constant 0 : index
    %c0_50 = arith.constant 0 : index
    %c0_51 = arith.constant 0 : index
    %148 = vector.load %arg3[%c0_49, %c0_50, %c0_51] : memref<1x8x32xf32, #tpu.memory_space<vmem>>, vector<1x8x32xf32>
    tpu.vector_store %arg3[%c0_49, %c0_50, %c0_51], %147 {strides = array<i32>} : memref<1x8x32xf32, #tpu.memory_space<vmem>>, vector<1x8x32xf32>,
    return
  }
  func.func @transform_0(%arg0: i32) -> (i32, i32, i32) {
    %c0_i32 = arith.constant 0 : i32
    %c0_i32_0 = arith.constant 0 : i32
    %c0_i32_1 = arith.constant 0 : i32
    return %arg0, %c0_i32, %c0_i32_0 : i32, i32, i32
  }
  func.func @transform_1(%arg0: i32) -> (i32, i32) {
    %c0_i32 = arith.constant 0 : i32
    %c0_i32_0 = arith.constant 0 : i32
    %c0_i32_1 = arith.constant 0 : i32
    return %c0_i32, %c0_i32_0 : i32, i32
  }
  func.func @transform_2(%arg0: i32) -> (i32, i32, i32) {
    %c0_i32 = arith.constant 0 : i32
    %c0_i32_0 = arith.constant 0 : i32
    %c0_i32_1 = arith.constant 0 : i32
    return %arg0, %c0_i32, %c0_i32_0 : i32, i32, i32
  }
}

</mosaic_0001>

<bundles_post_ra>
// kernel: tpu_custom_call.1
= control target key start
LH: loop header
LB: loop body
LE: loop exit
PB: predicated region body
PF: predicated region fallthrough
CT: control target
= control target key end

     0   :  { %7 = vsyncpa [#allocation3], 0  ;;  %s2146_s0 = inlined_call_operand.hbm [shape: f32[2,8,32], index: 0, kind: input, shape index: {}]   ;;  %s2147_s1 = inlined_call_operand.hbm [shape: f32[232,128], index: 1, kind: input, shape index: {}]   ;;  %s2148_s2 = inlined_call_operand.hbm [shape: f32[2,8,32], index: 2, kind: output, shape index: {}]  }
   0x1   :  { %9 = vsyncpa [#allocation3 + $0x1], 0 }
   0x2   :  { %10 = vsyncpa [#allocation6], 0 }
   0x3   :  { %11 = vsyncpa [#allocation4], 0 }
   0x4   :  { %13 = vsyncpa [#allocation4 + $0x1], 0  ;;  %s1832_s9 = smov 0   ;;  %s1834_s10 = smov 0  }
   0x5   :  { %s1836_s11 = smov 0   ;;  %s1838_s12 = smov 0  }
   0x6 LB: > { %s1853_s13 = sadd.s32 4294967295, %s1792_s12   ;;  %s1337_s14 = sadd.s32 4294967294, %s1792_s12   ;;  %s1792_s12 = sphi %s1838_s12, %s2168_s12   ;;  %s1788_s11 = sphi %s1836_s11, %s2167_s11   ;;  %s1784_s10 = sphi %s1834_s10, %s2166_s10   ;;  %s1780_s9 = sphi %s1832_s9, %s2165_s9  }
   0x7   : > { %p39_p0 = scmp.ne.s32.totalorder %s1784_s10, %s1780_s9  ;;  %p2149_p1 = scmp.eq.s32.totalorder %s1853_s13, 0 }
   0x8   : > { %p90_p3 = scmp.eq.s32.totalorder %s1337_s14, 1  ;;  %p1338_p5 = scmp.ge.s32.totalorder %s1792_s12, 1 }
   0x9   : > { %p1862_p4 = por %p2149_p1, %p39_p0  ;;  %p97_p7 = scmp.lt.s32.totalorder %s1792_s12, 3 }
   0xa   : > { %p1867_p6 = por %p90_p3, %p39_p0  ;;  %s1794_s18 = smov [#allocation5]  }
   0xb   : > { %s2152_s15 = scalar_select %p1862_p4, 1, 0 }
   0xc   : > { %s2153_s16 = scalar_select %p1867_p6, 1, 0 }
   0xd   : > { %p1872_p8 = pnand %p1338_p5, %p97_p7  ;;  %s109_s19 = sshll.u32 %s1794_s18, 4  ;;  %s1876_s19 = int_to_ptr.vmem [resolvable:$true] %s109_s19 }
   0xe   : > { %s1888_s21 = sadd.s32 1, %s1792_s12   ;;  %s26_s22 = sadd.s32 1, %s1788_s11 }
   0xf   : > { %s2154_s17 = scalar_select %p1872_p8, 1, 0 }
  0x10   : > { %p1575_p9 = pneg %p1872_p8  ;;  %s23_s23 = ssub.s32 %s1792_s12, %s1888_s21 }
  0x11   : > { %s1664_s26 = scalar_lea.hbm %s2147_s1, 3712 }
  0x12   : > { %p1883_p11 = pnand %p1575_p9, %p2149_p1  ;;  %p1665_p12 = scmp.ne.s32.totalorder %s2147_s1, %s1664_s26 }
  0x13   : > { %p1671_p5 = scmp.lt.u32.totalorder %s1664_s26, %s2147_s1 }
  0x14   : > { %p1666_p13 = pneg %p1883_p11 }
  0x16   : > { %p1667_p0 = pnand %p1666_p13, %p1665_p12 }
  0x18   : > { %p1668_p3 = pneg %p1667_p0 }
  0x1a   : > { %p1673_p7 = pnand %p1671_p5, %p1668_p3 }
  0x1c   : > { %1676 = shalt.err (!%p1673_p7)
}
  0x1d   : > { %s1677_s3 = scalar_lea.vmem %s1876_s19, 3712  ;;  %p1685_p2 = scmp.lt.s32.totalorder %s1876_s19, %s1876_s19 }
  0x1e   : > { %p1678_p9 = scmp.ne.s32.totalorder %s1876_s19, %s1677_s3  ;;  %p1686_p6 = scmp.lt.s32.totalorder %s1677_s3, %s1677_s3 }
  0x20   : > { %p1680_p10 = pnand %p1678_p9, %p1666_p13  ;;  %p1687_p4 = por %p1686_p6, %p1685_p2 }
  0x22   : > { %p1681_p1 = pneg %p1680_p10 }
  0x24   : > { %p1688_p8 = pnand %p1687_p4, %p1681_p1 }
  0x26   : > { %1691 = shalt.err (!%p1688_p8)
}
  0x27   : > { %s1795_s4 = smov 128   ;;  %s1796_s5 = smov 8  }
  0x28   : > { %1578 = dma.hbm_to_vmem [thread:$0]  (!%p1883_p11), %s2147_s1, 3712, %s1876_s19, [#allocation6], %s1795_s4, %s1795_s4, %s1796_s5  }
  0x29   : > { %p24_p2 = scmp.eq.s32.totalorder %s23_s23, 0  ;;  %p33_p1 = scmp.ne.s32.totalorder %s1788_s11, %s1784_s10 }
  0x2a   : > { %p34_p4 = scmp.eq.s32.totalorder %s1792_s12, 0  ;;  %p1588_p6 = scmp.lt.s32.totalorder %s1792_s12, 2 }
  0x2b   : > { %s1919_s8 = scalar_select %p24_p2, %s1788_s11, %s26_s22  }
  0x2c   : > { %p35_p8 = por %p34_p4, %p33_p1  ;;  %p2156_p10 = scmp.eq.s32.totalorder %s1853_s13, 1 }
  0x2d   : > { %s123_s18 = sand.u32 1, %s1788_s11   ;;  %s1342_s24 = sshll.u32 %s1792_s12, 7 }
  0x2e   : > { %p1923_p12 = por %p2156_p10, %p33_p1  ;;  %s1341_s25 = sshll.u32 %s123_s18, 3 }
  0x2f   : > { %s1932_s27 = scalar_lea.hbm %s2146_s0, %s1342_s24  ;;  %s127_s19 = scalar_lea.vmem [#allocation2], %s1341_s25 }
  0x30   : > { %s134_s22 = sshll.u32 %s127_s19, 4  ;;  %p1934_p11 = pnand %p1588_p6, %p35_p8  ;;  %s1938_s22 = int_to_ptr.vmem [resolvable:$true] %s134_s22 }
  0x31   : > { %s124_s28 = scalar_lea.sflag [#allocation3], %s123_s18  ;;  %s1692_s29 = scalar_lea.hbm %s1932_s27, 128 }
  0x32   : > { %p1693_p13 = scmp.ne.s32.totalorder %s1932_s27, %s1692_s29  ;;  %p1694_p0 = pneg %p1934_p11 }
  0x33   : > { %s1697_s4 = scalar_lea.hbm %s2146_s0, 256  ;;  %p1698_p7 = scmp.lt.u32.totalorder %s1932_s27, %s2146_s0 }
  0x34   : > { %p1695_p3 = pnand %p1694_p0, %p1693_p13  ;;  %p1699_p9 = scmp.lt.u32.totalorder %s1697_s4, %s1692_s29 }
  0x35   : > { %p1701_p1 = scmp.lt.u32.totalorder %s1692_s29, %s1932_s27 }
  0x36   : > { %p1696_p5 = pneg %p1695_p3  ;;  %p1700_p2 = por %p1699_p9, %p1698_p7 }
  0x38   : > { %p1702_p4 = por %p1701_p1, %p1700_p2 }
  0x3a   : > { %p1703_p6 = pnand %p1702_p4, %p1696_p5 }
  0x3c   : > { %1706 = shalt.err (!%p1703_p6)
}
  0x3d   : > { %s1707_s7 = scalar_lea.vmem %s1938_s22, 128  ;;  %s1797_s18 = smov [#allocation2]  }
  0x3e   : > { %p1708_p8 = scmp.ne.s32.totalorder %s1938_s22, %s1707_s7  ;;  %s1712_s24 = sshll.u32 %s1797_s18, 4  ;;  %s1713_s24 = int_to_ptr.vmem [resolvable:$false] %s1712_s24 }
  0x3f   : > { %s1714_s25 = scalar_lea.vmem %s1713_s24, 256  ;;  %p1715_p3 = scmp.lt.s32.totalorder %s1938_s22, %s1713_s24 }
  0x40   : > { %p1710_p10 = pnand %p1708_p8, %p1694_p0  ;;  %p1716_p7 = scmp.lt.s32.totalorder %s1714_s25, %s1707_s7 }
  0x42   : > { %p1711_p13 = pneg %p1710_p10  ;;  %p1717_p9 = por %p1716_p7, %p1715_p3 }
  0x44   : > { %p1718_p2 = pnand %p1717_p9, %p1711_p13 }
  0x46   : > { %1721 = shalt.err (!%p1718_p2)
}
  0x47   : > { %1582 = dma.hbm_to_vmem [thread:$0]  (!%p1934_p11), %s1932_s27, 128, %s1938_s22, %s124_s28  }
  0x48   : > { %p2159_p5 = scmp.ne.s32.totalorder %s2154_s17, 0 }
  0x49   : > { %s1968_s20 = sand.u32 (!%p2159_p5), 1, %s1784_s10   ;;  %p2160_p0 = scmp.ne.s32.totalorder (!%p2159_p5), %s2152_s15, 0 }
  0x4a   : > { %143 = sbr.rel (%p2159_p5) target bundleno = 2616 (0xa38), region = 28  ;;  %s1344_s26 = sshll.u32 (!%p2159_p5), %s1968_s20, 3 }
  0x4b   : > { %s146_s19 = scalar_lea.sflag (!%p2159_p5), [#allocation3], %s1968_s20  ;;  %s149_s29 = scalar_lea.vmem (!%p2159_p5), [#allocation2], %s1344_s26 }
  0x51   : > { %1767 = dma.done.wait (%p2160_p0), %s146_s19, 128  }
  0x52   : > { %1769 = vsyncadd (%p2160_p0), %s146_s19, 4294967168  ;;  %p2161_p11 = scmp.eq.s32.totalorder %s1853_s13, 0 }
  0x54   : > { %1771 = dma.done.wait (%p2161_p11), [#allocation6], 3712   ;;  %p2162_p1 = pmov %p2161_p11 }
  0x55   : > { %vm206_vm0 = vcmask 261120   ;;  %v1982_v0 = vld [vmem:[%s149_s29] sm:$0xff]  ;;  %v1986_v2 = vld [vmem:[#allocation5] ss:$0 sm:$0xff]  ;;  %s1798_s17 = smov 96   ;;  %v178_v8 = vld [vmem:[#allocation5 + $0x8] sm:$0xff]  ;;  %v304_v33 = vlaneseq }
  0x56   : > { %1773 = vsyncadd (%p2162_p1), [#allocation6], 4294963584  ;;  %v207_v1 = vsel %vm206_vm0, %v1982_v0, 0.0  ;;  %227 = vrot.lane.b32.xlu1 %v1986_v2, %s1798_s17  ;;  %v179_v9 = vld [vmem:[#allocation5 + $0x10] sm:$0xff]  ;;  %v180_v10 = vld [vmem:[#allocation5 + $0x18] sm:$0xff]  ;;  %v1799_v11 = vmov 0.0|0.0  }
  0x57   : > { %208 = vadd.xlane.f32.xlu0 %v207_v1  ;;  %1525 = vmatprep.subr.bf16.mxu1 %v1799_v11  ;;  %v1526_v12 = vpack.c.bf16 %v179_v9, %v178_v8  ;;  %v181_v13 = vld [vmem:[#allocation5 + $0x20] sm:$0xff]  ;;  %vm1800_vm1 = vmmov 0   ;;  %v1801_v15 = vmov 0.0   ;;  %s1802_s15 = smov 88   ;;  %s1803_s27 = smov 120   ;;  %vm312_vm2 = vcmask 64512  }
  0x58   : > { %v1529_v14 = vpack.c.bf16 %v181_v13, %v180_v10  ;;  %1425 = vmatprep.mubr.msk.f32.mxu1 %vm1800_vm1, %v1801_v15  ;;  %1438 = vmatprep.subr.mxu0 %v1801_v15  ;;  %s1804_s22 = smov 80   ;;  %s1805_s23 = smov 112   ;;  %v305_v34 = vshrl.u32 %v304_v33, 7  ;;  %v307_v35 = vand.u32 127, %v304_v33  ;;  %vm986_vm4 = vcmask 130048  }
  0x59   : > { %1527 = vmatpush3.bf16.msra.mxu1 %v1526_v12  ;;  %1440 = vmatprep.mubr.msk.f32.mxu0 %vm1800_vm1, %v1801_v15  ;;  %s1806_s28 = smov 72   ;;  %s1807_s30 = smov 104   ;;  %vm988_vm5 = vcmask 195584  }
  0x5a   : > { %1528 = vmatprep.subr.bf16.mxu1 %v1799_v11  ;;  %vm308_vm3 = vcmp.ge.s32.totalorder %v305_v34, %v307_v35  ;;  %s1808_s3 = smov 56   ;;  %s1809_s4 = smov 64   ;;  %v184_v35 = vld [vmem:[#allocation5 + $0x38] sm:$0xff] }
  0x5b   : > { %s1810_s5 = smov 48   ;;  %s1811_s6 = smov 40  }
  0x5c   : > { %s1812_s7 = smov 8   ;;  %s1813_s18 = smov 16  }
  0x5d   : > { %1530 = vmatpush3.bf16.msra.mxu1 %v1529_v14  ;;  %s1814_s24 = smov 24   ;;  %s1815_s25 = smov 32  }
  0x5e   : > { %1428 = vmatprep.subr.mxu1 %v1801_v15  ;;  %s1366_s19 = sshll.u32 %s1853_s13, 7  ;;  %s173_s29 = scalar_lea.vmem [#allocation7], %s1344_s26 }
  0x5f   : > { %s1244_s13 = scalar_lea.sflag [#allocation4], %s1968_s20  ;;  %s1816_s26 = smov [#allocation7]  }
  0xc8   : > { %v228_v21 = vpop.permute.xlu1 %227 }
  0xe4   : > { %v209_v3 = vpop.xlane.xlu0 %208 }
  0xe5   : > { %v211_v4 = vmul.f32 0.03125, %v209_v3 }
  0xe7   : > { %v212_v5 = vsub.f32 %v1982_v0, %v211_v4 }
  0xe9   : > { %v213_v6 = vmul.f32 %v212_v5, %v212_v5 }
  0xeb   : > { %v214_v7 = vsel %vm206_vm0, %v213_v6, 0.0 }
  0xec   : > { %215 = vadd.xlane.f32.xlu0 %v214_v7 }
 0x179   : > { %v216_v16 = vpop.xlane.xlu0 %215 }
 0x17a   : > { %v217_v17 = vmul.f32 0.03125, %v216_v16 }
 0x17c   : > { %v218_v18 = vadd.f32 1e-05, %v217_v17 }
 0x17e   : > { %1644 = vrsqrt.f32 %v218_v18 }
 0x188   : > { %v1645_v19 = vpop.eup %1644 }
 0x189   : > { %v220_v20 = vmul.f32 %v1645_v19, %v212_v5 }
 0x18b   : > { %v225_v22 = vmul.f32 %v1986_v2, %v220_v20 }
 0x18d   : > { %v230_v23 = vadd.f32 %v228_v21, %v225_v22 }
 0x18f   : > { %1426 = vmatmul.mubr.msk.f32.vlgmr.msra.gmra.mrb[0].mxu1 %vm206_vm0, %v230_v23 }
 0x190   : > { %1430 = vmatprep.mubr.msk.f32.mxu1 %vm1800_vm1, %v1801_v15 }
 0x262   : > { %v2004_v24 = vpop.f32.mrb[0].mxu1 }
 0x263   : > { %477 = vrot.lane.b32.xlu0 %v2004_v24, %s1802_s15  ;;  %310 = vrot.lane.b32.xlu1 %v2004_v24, %s1798_s17  ;;  %v1427_v25 = vpop.f32.mrb[1].mxu1 }
 0x267   : > { %475 = vrot.lane.b32.xlu1 %v2004_v24, %s1803_s27 }
 0x26b   : > { %643 = vrot.lane.b32.xlu1 %v2004_v24, %s1804_s22  ;;  %s2101_s22 = scalar_lea.hbm %s2148_s2, %s1366_s19 }
 0x26f   : > { %641 = vrot.lane.b32.xlu1 %v2004_v24, %s1805_s23 }
 0x273   : > { %809 = vrot.lane.b32.xlu1 %v2004_v24, %s1806_s28  ;;  %s1726_s28 = sshll.u32 %s1816_s26, 4  ;;  %s1727_s28 = int_to_ptr.vmem [resolvable:$false] %s1726_s28 }
 0x277   : > { %807 = vrot.lane.b32.xlu1 %v2004_v24, %s1807_s30  ;;  %s1728_s30 = scalar_lea.vmem %s1727_s28, 256 }
 0x2d5   : > { %v478_v26 = vpop.permute.xlu0 %477  ;;  %v311_v27 = vpop.permute.xlu1 %310 }
 0x2d6   : > { %1429 = vmatpush3.xpose.msk.msra.mxu1 %vm312_vm2, %v311_v27  ;;  %1439 = vmatpush3.xpose.msk.msra.mxu0 %vm312_vm2, %v478_v26 }
 0x2d7   : > { %1448 = vmatprep.subr.mxu0 %v1801_v15  ;;  %1433 = vmatprep.subr.mxu1 %v1801_v15 }
 0x2d9   : > { %1431 = vmatmul.mubr.msk.f32.vlgmr.msra.gmra.mrb[2].mxu1 %vm312_vm2, %v2004_v24  ;;  %v476_v28 = vpop.permute.xlu1 %475 }
 0x2da   : > { %1441 = vmatmul.mubr.msk.f32.vlgmr.msra.gmra.mrb[0].mxu0 %vm312_vm2, %v476_v28  ;;  %1435 = vmatprep.mubr.msk.f32.mxu1 %vm1800_vm1, %v1801_v15  ;;  %v182_v28 = vld [vmem:[#allocation5 + $0x28] sm:$0xff] }
 0x2db   : > { %1450 = vmatprep.mubr.msk.f32.mxu0 %vm1800_vm1, %v1801_v15 }
 0x2dd   : > { %v644_v29 = vpop.permute.xlu1 %643 }
 0x2de   : > { %1449 = vmatpush3.xpose.msk.msra.mxu0 %vm312_vm2, %v644_v29  ;;  %v183_v29 = vld [vmem:[#allocation5 + $0x30] sm:$0xff] }
 0x2df   : > { %1458 = vmatprep.subr.mxu0 %v1801_v15 }
 0x2e1   : > { %v642_v30 = vpop.permute.xlu1 %641 }
 0x2e2   : > { %1451 = vmatmul.mubr.msk.f32.vlgmr.msra.gmra.mrb[2].mxu0 %vm312_vm2, %v642_v30  ;;  %v1532_v30 = vpack.c.bf16 %v183_v29, %v182_v28 }
 0x2e3   : > { %1460 = vmatprep.mubr.msk.f32.mxu0 %vm1800_vm1, %v1801_v15 }
 0x2e5   : > { %v810_v31 = vpop.permute.xlu1 %809 }
 0x2e6   : > { %1459 = vmatpush3.xpose.msk.msra.mxu0 %vm312_vm2, %v810_v31 }
 0x2e7   : > { %1543 = vmatprep.subr.bf16.mxu0 %v1799_v11 }
 0x2e9   : > { %v808_v32 = vpop.permute.xlu1 %807 }
 0x2ea   : > { %1461 = vmatmul.mubr.msk.f32.vlgmr.msra.gmra.mrb[4].mxu0 %vm312_vm2, %v808_v32 }
 0x2eb   : > { %1522 = vmatprep.mubr.msk.f32.mxu0 %vm1800_vm1, %v1801_v15 }
 0x3ac   : > { %v383_v36 = vpop.f32.mrb[2].mxu1 }
 0x3ad   : > { %v387_v37 = vsel %vm308_vm3, %v383_v36, -inf  ;;  %v1432_v38 = vpop.f32.mrb[3].mxu1  ;;  %v549_v39 = vpop.f32.mrb[0].mxu0  ;;  %v185_v36 = vld [vmem:[#allocation5 + $0x40] sm:$0xff] }
 0x3ae   : > { %v553_v40 = vsel %vm308_vm3, %v549_v39, -inf  ;;  %v1442_v41 = vpop.f32.mrb[1].mxu0  ;;  %v388_v42 = vsel %vm312_vm2, %v387_v37, -inf }
 0x3af   : > { %389 = vmax.xlane.f32.xlu1 %v388_v42  ;;  %v554_v43 = vsel %vm312_vm2, %v553_v40, -inf }
 0x3b0   : > { %555 = vmax.xlane.f32.xlu0 %v554_v43 }
 0x3b5   : > { %v715_v44 = vpop.f32.mrb[2].mxu0 }
 0x3b6   : > { %v719_v45 = vsel %vm308_vm3, %v715_v44, -inf  ;;  %v1452_v46 = vpop.f32.mrb[3].mxu0 }
 0x3b7   : > { %v720_v47 = vsel %vm312_vm2, %v719_v45, -inf }
 0x3b8   : > { %721 = vmax.xlane.f32.xlu0 %v720_v47 }
 0x3bd   : > { %v881_v48 = vpop.f32.mrb[4].mxu0 }
 0x3be   : > { %v885_v49 = vsel %vm308_vm3, %v881_v48, -inf  ;;  %v1462_v50 = vpop.f32.mrb[5].mxu0  ;;  %v1361_v48 = vld [vmem:[#allocation5 + $0x2] ss:$0 sm:$0xff] }
 0x3bf   : > { %v886_v51 = vsel %vm312_vm2, %v885_v49, -inf }
 0x3c0   : > { %887 = vmax.xlane.f32.xlu1 %v886_v51 }
 0x3d1   : > { %565 = vrot.lane.b32.xlu1 %v2004_v24, %s1808_s3 }
 0x43c   : > { %v390_v52 = vpop.xlane.xlu1 %389 }
 0x43d   : > { %v391_v53 = vsub.f32 %v387_v37, %v390_v52  ;;  %v556_v54 = vpop.xlane.xlu0 %555  ;;  %v1535_v37 = vpack.c.bf16 %v185_v36, %v184_v35  ;;  %v1363_v35 = vld [vmem:[#allocation5 + $0x1] ss:$0 sm:$0xff] }
 0x43e   : > { %v557_v55 = vsub.f32 %v553_v40, %v556_v54 }
 0x43f   : > { %v392_v56 = vmul.f32 1.442695, %v391_v53 }
 0x440   : > { %v558_v57 = vmul.f32 1.442695, %v557_v55 }
 0x441   : > { %1646 = vpow2.f32 %v392_v56 }
 0x442   : > { %1648 = vpow2.f32 %v558_v57 }
 0x445   : > { %v722_v5 = vpop.xlane.xlu0 %721 }
 0x446   : > { %v723_v6 = vsub.f32 %v719_v45, %v722_v5  ;;  %v193_v5 = vld [vmem:[#allocation5 + $0x80] sm:$0xff] }
 0x448   : > { %v724_v7 = vmul.f32 1.442695, %v723_v6 }
 0x44b   : > { %v1647_v58 = vpop.eup %1646 }
 0x44c   : > { %v1649_v59 = vpop.eup %1648  ;;  %v394_v60 = vsel %vm312_vm2, %v1647_v58, 0.0 }
 0x44d   : > { %395 = vadd.xlane.f32.xlu0 %v394_v60  ;;  %v888_v61 = vpop.xlane.xlu1 %887  ;;  %v560_v62 = vsel %vm312_vm2, %v1649_v59, 0.0  ;;  %v188_v60 = vld [vmem:[#allocation5 + $0x58] sm:$0xff] }
 0x44e   : > { %v889_v63 = vsub.f32 %v885_v49, %v888_v61  ;;  %561 = vadd.xlane.f32.xlu1 %v560_v62  ;;  %v189_v61 = vld [vmem:[#allocation5 + $0x60] sm:$0xff] }
 0x44f   : > { %v1541_v62 = vpack.c.bf16 %v189_v61, %v188_v60 }
 0x450   : > { %v890_v1 = vmul.f32 1.442695, %v889_v63  ;;  %v190_v63 = vld [vmem:[#allocation5 + $0x68] sm:$0xff] }
 0x451   : > { %v566_v10 = vpop.permute.xlu1 %565 }
 0x452   : > { %1650 = vpow2.f32 %v890_v1  ;;  %v191_v1 = vld [vmem:[#allocation5 + $0x70] sm:$0xff] }
 0x453   : > { %1652 = vpow2.f32 %v724_v7  ;;  %v195_v7 = vld [vmem:[#allocation5 + $0x90] sm:$0xff] }
 0x45c   : > { %v1651_v3 = vpop.eup %1650 }
 0x45d   : > { %v892_v4 = vsel %vm312_vm2, %v1651_v3, 0.0  ;;  %v1653_v8 = vpop.eup %1652 }
 0x45e   : > { %893 = vadd.xlane.f32.xlu1 %v892_v4  ;;  %v726_v9 = vsel %vm312_vm2, %v1653_v8, 0.0  ;;  %v1544_v4 = vpack.c.bf16 %v191_v1, %v190_v63 }
 0x460   : > { %1545 = vmatpush3.bf16.msra.mxu0 %v1544_v4 }
 0x461   : > { %1546 = vmatprep.subr.bf16.mxu0 %v1799_v11 }
 0x463   : > { %399 = vrot.lane.b32.xlu0 %v2004_v24, %s1809_s4 }
 0x46f   : > { %731 = vrot.lane.b32.xlu1 %v2004_v24, %s1810_s5 }
 0x482   : > { %727 = vadd.xlane.f32.xlu0 %v726_v9  ;;  %v196_v9 = vld [vmem:[#allocation5 + $0x98] sm:$0xff] }
 0x498   : > { %897 = vrot.lane.b32.xlu0 %v2004_v24, %s1811_s6 }
 0x4da   : > { %v396_v12 = vpop.xlane.xlu0 %395 }
 0x4db   : > { %1654 = vrcp.f32 %v396_v12  ;;  %v562_v13 = vpop.xlane.xlu1 %561 }
 0x4dc   : > { %1656 = vrcp.f32 %v562_v13  ;;  %v198_v13 = vld [vmem:[#allocation5 + $0xa8] sm:$0xff] }
 0x4de   : > { %v400_v14 = vpop.permute.xlu0 %399 }
 0x4df   : > { %1434 = vmatpush3.msra.mxu1 %v400_v14  ;;  %v199_v14 = vld [vmem:[#allocation5 + $0xb0] sm:$0xff] }
 0x4e0   : > { %1443 = vmatprep.subr.mxu1 %v1801_v15 }
 0x4e5   : > { %v1655_v16 = vpop.eup %1654 }
 0x4e6   : > { %v398_v17 = vmul.f32 %v1655_v16, %v1647_v58  ;;  %v1657_v18 = vpop.eup %1656  ;;  %v187_v58 = vld [vmem:[#allocation5 + $0x50] sm:$0xff]  ;;  %v1556_v16 = vpack.c.bf16 %v199_v14, %v198_v13 }
 0x4e7   : > { %v564_v19 = vmul.f32 %v1657_v18, %v1649_v59  ;;  %v201_v18 = vld [vmem:[#allocation5 + $0xc0] sm:$0xff] }
 0x4e8   : > { %1436 = vmatmul.mubr.msk.f32.vlgmr.msra.gmra.mrb[4].mxu1 %vm312_vm2, %v398_v17  ;;  %v200_v17 = vld [vmem:[#allocation5 + $0xb8] sm:$0xff] }
 0x4e9   : > { %1444 = vmatpush3.msra.mxu1 %v566_v10  ;;  %1445 = vmatprep.mubr.msk.f32.mxu1 %vm1800_vm1, %v1801_v15  ;;  %v197_v10 = vld [vmem:[#allocation5 + $0xa0] sm:$0xff] }
 0x4ea   : > { %1453 = vmatprep.subr.mxu1 %v1801_v15  ;;  %v1553_v12 = vpack.c.bf16 %v197_v10, %v196_v9 }
 0x4eb   : > { %v894_v20 = vpop.xlane.xlu1 %893 }
 0x4ec   : > { %1446 = vmatmul.mubr.msk.f32.vlgmr.msra.gmra.mrb[6].mxu1 %vm312_vm2, %v564_v19  ;;  %v1559_v19 = vpack.c.bf16 %v201_v18, %v200_v17 }
 0x4ed   : > { %1455 = vmatprep.mubr.msk.f32.mxu1 %vm1800_vm1, %v1801_v15 }
 0x4ef   : > { %v732_v21 = vpop.permute.xlu1 %731 }
 0x4f0   : > { %1454 = vmatpush3.msra.mxu1 %v732_v21  ;;  %v203_v21 = vld [vmem:[#allocation5 + $0xd0] sm:$0xff] }
 0x4f1   : > { %1463 = vmatprep.subr.mxu1 %v1801_v15 }
 0x50f   : > { %v728_v22 = vpop.xlane.xlu0 %727 }
 0x510   : > { %1658 = vrcp.f32 %v728_v22 }
 0x511   : > { %1660 = vrcp.f32 %v894_v20  ;;  %v202_v20 = vld [vmem:[#allocation5 + $0xc8] sm:$0xff] }
 0x512   : > { %v1562_v22 = vpack.c.bf16 %v203_v21, %v202_v20 }
 0x513   : > { %v898_v26 = vpop.permute.xlu0 %897 }
 0x51a   : > { %v1659_v23 = vpop.eup %1658 }
 0x51b   : > { %v730_v24 = vmul.f32 %v1659_v23, %v1653_v8  ;;  %v1661_v25 = vpop.eup %1660 }
 0x51c   : > { %v896_v27 = vmul.f32 %v1661_v25, %v1651_v3  ;;  %v192_v3 = vld [vmem:[#allocation5 + $0x78] sm:$0xff] }
 0x51d   : > { %1456 = vmatmul.mubr.msk.f32.vlgmr.msra.gmra.mrb[8].mxu1 %vm312_vm2, %v730_v24  ;;  %v1547_v6 = vpack.c.bf16 %v193_v5, %v192_v3 }
 0x51e   : > { %1464 = vmatpush3.msra.mxu1 %v898_v26  ;;  %1465 = vmatprep.mubr.msk.f32.mxu1 %vm1800_vm1, %v1801_v15 }
 0x51f   : > { %1531 = vmatprep.subr.bf16.mxu1 %v1799_v11  ;;  %1548 = vmatpush3.bf16.msra.mxu0 %v1547_v6 }
 0x520   : > { %1549 = vmatprep.subr.bf16.mxu0 %v1799_v11 }
 0x521   : > { %1466 = vmatmul.mubr.msk.f32.vlgmr.msra.gmra.mrb[10].mxu1 %vm312_vm2, %v896_v27 }
 0x522   : > { %1476 = vmatprep.mubr.msk.f32.mxu1 %vm1800_vm1, %v1801_v15  ;;  %1533 = vmatpush3.bf16.msra.mxu1 %v1532_v30 }
 0x523   : > { %1534 = vmatprep.subr.bf16.mxu1 %v1799_v11 }
 0x526   : > { %1536 = vmatpush3.bf16.msra.mxu1 %v1535_v37 }
 0x527   : > { %1537 = vmatprep.subr.bf16.mxu1 %v1799_v11 }
 0x5bb   : > { %v471_v31 = vpop.f32.mrb[4].mxu1 }
 0x5bc   : > { %v1437_v32 = vpop.f32.mrb[5].mxu1 }
 0x5bd   : > { %v204_v32 = vld [vmem:[#allocation5 + $0xd8] sm:$0xff] }
 0x5bf   : > { %v637_v33 = vpop.f32.mrb[6].mxu1 }
 0x5c0   : > { %974 = vrot.lane.b32.xlu1 %v637_v33, %s1812_s7  ;;  %v1447_v34 = vpop.f32.mrb[7].mxu1  ;;  %v205_v33 = vld [vmem:[#allocation5 + $0xe0] sm:$0xff] }
 0x5c1   : > { %v1565_v34 = vpack.c.bf16 %v205_v33, %v204_v32 }
 0x5f0   : > { %v803_v38 = vpop.f32.mrb[8].mxu1 }
 0x5f1   : > { %978 = vrot.lane.b32.xlu0 %v803_v38, %s1813_s18  ;;  %v1457_v39 = vpop.f32.mrb[9].mxu1 }
 0x5f4   : > { %v969_v40 = vpop.f32.mrb[10].mxu1 }
 0x5f5   : > { %982 = vrot.lane.b32.xlu1 %v969_v40, %s1814_s24  ;;  %v1467_v41 = vpop.f32.mrb[11].mxu1 }
 0x632   : > { %v975_v42 = vpop.permute.xlu1 %974 }
 0x633   : > { %v985_v44 = vsel %vm312_vm2, %v471_v31, %v975_v42 }
 0x663   : > { %v979_v43 = vpop.permute.xlu0 %978 }
 0x664   : > { %v987_v45 = vsel %vm986_vm4, %v985_v44, %v979_v43 }
 0x667   : > { %v983_v46 = vpop.permute.xlu1 %982 }
 0x668   : > { %v989_v47 = vsel %vm988_vm5, %v987_v45, %v983_v46 }
 0x669   : > { %1477 = vmatmul.mubr.msk.f32.vlgmr.msra.gmra.mrb[12].mxu1 %vm206_vm0, %v989_v47 }
 0x66a   : > { %1487 = vmatprep.mubr.msk.f32.mxu1 %vm1800_vm1, %v1801_v15 }
 0x73c   : > { %v1063_v49 = vpop.f32.mrb[12].mxu1 }
 0x73d   : > { %v1064_v50 = vadd.f32 %v1361_v48, %v1063_v49  ;;  %v1478_v51 = vpop.f32.mrb[13].mxu1 }
 0x73f   : > { %v2075_v52 = vadd.f32 %v1064_v50, %v1982_v0  ;;  %v186_v0 = vld [vmem:[#allocation5 + $0x48] sm:$0xff] }
 0x740   : > { %v1538_v59 = vpack.c.bf16 %v187_v58, %v186_v0 }
 0x741   : > { %v1068_v53 = vsel %vm206_vm0, %v2075_v52, 0.0 }
 0x742   : > { %1069 = vadd.xlane.f32.xlu0 %v1068_v53  ;;  %1539 = vmatpush3.bf16.msra.mxu1 %v1538_v59 }
 0x743   : > { %1540 = vmatprep.subr.bf16.mxu1 %v1799_v11 }
 0x746   : > { %1542 = vmatpush3.bf16.msra.mxu1 %v1541_v62 }
 0x758   : > { %1081 = vrot.lane.b32.xlu0 %v1986_v2, %s1809_s4 }
 0x75c   : > { %1168 = vrot.lane.b32.xlu0 %v1361_v48, %s1798_s17  ;;  %s1257_s17 = sshll.u32 %s173_s29, 4  ;;  %s2103_s17 = int_to_ptr.vmem [resolvable:$true] %s1257_s17 }
 0x75d   : > { %s1722_s23 = scalar_lea.vmem %s2103_s17, 128  ;;  %p1729_p10 = scmp.lt.s32.totalorder %s2103_s17, %s1727_s28 }
 0x75e   : > { %p1723_p4 = scmp.ne.s32.totalorder %s2103_s17, %s1722_s23  ;;  %p1730_p13 = scmp.lt.s32.totalorder %s1728_s30, %s1722_s23 }
 0x760   : > { %p1724_p6 = pnand %p1723_p4, %p1923_p12  ;;  %p1731_p3 = por %p1730_p13, %p1729_p10 }
 0x762   : > { %p1725_p8 = pneg %p1724_p6 }
 0x764   : > { %p1732_p7 = pnand %p1731_p3, %p1725_p8 }
 0x7cf   : > { %v1070_v54 = vpop.xlane.xlu0 %1069 }
 0x7d0   : > { %v1071_v55 = vmul.f32 0.03125, %v1070_v54 }
 0x7d2   : > { %v1072_v15 = vsub.f32 %v2075_v52, %v1071_v55 }
 0x7d3   : > { %v1082_v27 = vpop.permute.xlu0 %1081 }
 0x7d4   : > { %v1073_v56 = vmul.f32 %v1072_v15, %v1072_v15 }
 0x7d6   : > { %v1074_v57 = vsel %vm206_vm0, %v1073_v56, 0.0 }
 0x7d7   : > { %1075 = vadd.xlane.f32.xlu1 %v1074_v57  ;;  %v1169_v39 = vpop.permute.xlu0 %1168 }
 0x7e8   : > { %1085 = vrot.lane.b32.xlu1 %v1986_v2, %s1815_s25  ;;  %v194_v2 = vld [vmem:[#allocation5 + $0x88] sm:$0xff] }
 0x7e9   : > { %v1550_v8 = vpack.c.bf16 %v195_v7, %v194_v2 }
 0x7eb   : > { %1551 = vmatpush3.bf16.msra.mxu0 %v1550_v8 }
 0x7ec   : > { %1552 = vmatprep.subr.bf16.mxu0 %v1799_v11 }
 0x7ef   : > { %1554 = vmatpush3.bf16.msra.mxu0 %v1553_v12 }
 0x7f0   : > { %1555 = vmatprep.subr.bf16.mxu0 %v1799_v11 }
 0x7f3   : > { %1557 = vmatpush3.bf16.msra.mxu0 %v1556_v16 }
 0x7f4   : > { %1558 = vmatprep.subr.bf16.mxu0 %v1799_v11 }
 0x7f7   : > { %1560 = vmatpush3.bf16.msra.mxu0 %v1559_v19 }
 0x7f8   : > { %1561 = vmatprep.subr.bf16.mxu0 %v1799_v11 }
 0x7fb   : > { %1563 = vmatpush3.bf16.msra.mxu0 %v1562_v22 }
 0x7fc   : > { %1564 = vmatprep.subr.bf16.mxu0 %v1799_v11 }
 0x7ff   : > { %1566 = vmatpush3.bf16.msra.mxu0 %v1565_v34 }
 0x864   : > { %v1076_v23 = vpop.xlane.xlu1 %1075 }
 0x865   : > { %v1077_v24 = vmul.f32 0.03125, %v1076_v23 }
 0x867   : > { %v1078_v25 = vadd.f32 1e-05, %v1077_v24 }
 0x868   : > { %v1086_v29 = vpop.permute.xlu1 %1085 }
 0x869   : > { %1662 = vrsqrt.f32 %v1078_v25 }
 0x873   : > { %v1663_v26 = vpop.eup %1662 }
 0x874   : > { %v1080_v28 = vmul.f32 %v1663_v26, %v1072_v15 }
 0x876   : > { %v1084_v30 = vmul.f32 %v1082_v27, %v1080_v28 }
 0x878   : > { %v1088_v31 = vadd.f32 %v1086_v29, %v1084_v30 }
 0x87a   : > { %1488 = vmatmul.mubr.msk.f32.vlgmr.msra.gmra.mrb[14].mxu1 %vm206_vm0, %v1088_v31 }
 0x94d   : > { %v1162_v11 = vpop.f32.mrb[14].mxu1 }
 0x94e   : > { %v1163_v36 = vadd.f32 %v1363_v35, %v1162_v11  ;;  %v1489_v37 = vpop.f32.mrb[15].mxu1 }
 0x950   : > { %v1166_v38 = vmax.f32 %v1163_v36, 0.0 }
 0x952   : > { %1523 = vmatmul.mubr.f32.vlgmr.msra.gmra.mrb[6].mxu0 %v1166_v38 }
 0xa25   : > { %v1237_v40 = vpop.f32.mrb[6].mxu0 }
 0xa26   : > { %v1238_v41 = vadd.f32 %v1237_v40, %v1169_v39  ;;  %v1524_v42 = vpop.f32.mrb[7].mxu0 }
 0xa28   : > { %v1241_v43 = vadd.f32 %v1238_v41, %v2075_v52 }
 0xa2a   : > { %1242 = vst.msk [vmem:[%s173_s29] sm:$0xff] %vm206_vm0, %v1241_v43 }
 0xa2b   : > { %1735 = shalt.err (!%p1732_p7)
}
 0xa2c   : > { %s1736_s20 = scalar_lea.hbm %s2101_s22, 128  ;;  %s1740_s5 = scalar_lea.hbm %s2148_s2, 256 }
 0xa2d   : > { %p1737_p9 = scmp.ne.s32.totalorder %s2101_s22, %s1736_s20  ;;  %p1741_p0 = scmp.lt.u32.totalorder %s2101_s22, %s2148_s2 }
 0xa2e   : > { %p1742_p11 = scmp.lt.u32.totalorder %s1740_s5, %s1736_s20  ;;  %p1744_p4 = scmp.lt.u32.totalorder %s1736_s20, %s2101_s22 }
 0xa2f   : > { %p1738_p2 = pnand %p1737_p9, %p1923_p12 }
 0xa30   : > { %p1743_p1 = por %p1742_p11, %p1741_p0 }
 0xa31   : > { %p1739_p5 = pneg %p1738_p2 }
 0xa32   : > { %p1745_p6 = por %p1744_p4, %p1743_p1 }
 0xa34   : > { %p1746_p8 = pnand %p1745_p6, %p1739_p5 }
 0xa36   : > { %1749 = shalt.err (!%p1746_p8)
}
 0xa37   : > { %1573 = dma.vmem_to_hbm [thread:$0]  (%p1923_p12), %s2103_s17, 128, %s2101_s22, %s1244_s13  }
 0xa38 PF: > { %s1269_s18 = sand.u32 1, %s1780_s9   ;;  %p2163_p10 = scmp.ne.s32.totalorder %s2153_s16, 0 }
 0xa39   : > { %p2164_p13 = scmp.ge.s32.totalorder %s1792_s12, 2  ;;  %s1270_s24 = scalar_lea.sflag [#allocation4], %s1269_s18 }
 0xa3b   : > { %p1584_p3 = pnand %p2164_p13, %p2163_p10 }
 0xa3d   : > { %1775 = dma.done.wait (!%p1584_p3), %s1270_s24, 128  }
 0xa3e   : > { %1777 = vsyncadd (!%p1584_p3), %s1270_s24, 4294967168  ;;  %p16_p7 = scmp.ge.s32.totalorder %s1888_s21, 4   ;;  %s2165_s9 = smov %s1784_s10 }
 0xa3f   : > { %s2166_s10 = smov %s1788_s11  ;;  %s2167_s11 = smov %s1919_s8 }
 0xa40   : > { %s2168_s12 = smov %s1888_s21  ;;  %18 = sbr.rel (!%p16_p7) target bundleno = 6 (0x6), region = 77 }
 0xa47   :  { %1275 = vsyncpa [#allocation3], 1 }
 0xa48   :  { %1277 = vsyncpa [#allocation3 + $0x1], 1 }
 0xa49   :  { %1278 = vsyncpa [#allocation6], 1 }
 0xa4a   :  { %1279 = vsyncpa [#allocation4], 1 }
 0xa4b   :  { %1281 = vsyncpa [#allocation4 + $0x1], 1 }

</bundles_post_ra>
